<compile_context>
chip_gen: v6e
topology: v6e:2x2x1
jax: 0.10.0
libtpu: 0.0.40
codegen_flags: <defaults>
</compile_context>

<pallas_src>
import functools
import math

import jax
import jax.numpy as jnp
from jax.experimental import pallas as pl
from jax.experimental.pallas import tpu as pltpu

_LANE = 128
_FAST_PATH_BYTES = 128 * 1024   # below ~128 KiB: plain XLA exp (launch/layout overhead dominates)
_MIN_STEPS = 8                  # >= 4 grid steps per TensorCore on v7x -> real pipelining
_VMEM_MARGIN = 4 << 20          # headroom for compiler scratch on top of the double buffers


# ------------------------------ kernels -------------------------------------


def _exp_kernel(x_ref, o_ref):
    # Elementwise exp on the current VMEM tile (EUP transcendental; HBM-bound).
    o_ref[...] = jnp.exp(x_ref[...])


def _bwd_kernel(y_ref, g_ref, o_ref, *, lo, hi):
    # exp is monotonic, so g * exp(clamp(x, -c, c)) == g * clamp(exp(x), e^-c, e^c).
    # Using the saved forward output keeps the backward on the VPU only
    # (min/max + mul), no transcendental and no dependence on x.
    o_ref[...] = g_ref[...] * jnp.clip(y_ref[...], lo, hi)


# ------------------------- generation-aware params ---------------------------


@functools.lru_cache(maxsize=None)
def _gen_params():
    """(target_block_bytes, vmem_budget_bytes) sized per TPU generation."""
    try:
        vmem_cap = int(pltpu.get_tpu_info().vmem_capacity_bytes)
    except Exception:
        vmem_cap = 64 << 20                      # conservative default (v7x per-TC VMEM)
    if vmem_cap >= 100 << 20:                    # v5e / v6e: 128 MiB VMEM per core
        return 8 << 20, 80 << 20
    return 4 << 20, 36 << 20                     # v7x: 64 MiB per TC -> leave headroom


@functools.lru_cache(maxsize=None)
def _buffered_supported():
    """True if pl.BlockSpec(..., pipeline_mode=pl.Buffered(k)) is available."""
    if not hasattr(pl, "Buffered"):
        return False
    try:
        pl.BlockSpec((8, _LANE), lambda i: (i, 0), pipeline_mode=pl.Buffered(3))
        return True
    except Exception:
        return False


# ------------------------------ layout plan ----------------------------------


def _sublane_multiple(dtype):
    # f32 -> 8, bf16 -> 16, int8/fp8 -> 32 (packed sublane tiling).
    return max(8, 32 // max(1, jnp.dtype(dtype).itemsize))


def _plan_layout(n, dtype):
    """Plan a lane-dense view of a contiguous array of n elements.

    Returns (view_shape, block_shape, index_map, grid, block_bytes).
    """
    target_block_bytes, _ = _gen_params()
    itemsize = jnp.dtype(dtype).itemsize
    sub = _sublane_multiple(dtype)

    # Widest lane-dense column count that divides n exactly, so the 2D view is
    # a free reshape of the contiguous array (no pad, no extra HBM traffic).
    cols = None
    for c in (8192, 4096, 2048, 1024, 512, 256, _LANE):
        if n % c == 0:
            cols = c
            break

    if cols is not None:
        rows = n // cols
        row_bytes = cols * itemsize
        # Rows per block from the byte target, sublane-rounded for unmasked stores.
        tile_rows = max(sub, (target_block_bytes // row_bytes) // sub * sub)
        if rows <= sub:
            tile_rows = rows                      # full extent (single small block)
        else:
            # Keep >= _MIN_STEPS steps so both v7x TCs get >= 4 blocks each and
            # input-DMA / compute / writeback overlap on every generation.
            cap = max(sub, pl.cdiv(pl.cdiv(rows, _MIN_STEPS), sub) * sub)
            tile_rows = min(tile_rows, cap)
        grid = (pl.cdiv(rows, tile_rows),)
        return ((rows, cols), (tile_rows, cols), lambda i: (i, 0), grid,
                tile_rows * cols * itemsize)

    # Ragged size (n % 128 != 0): keep the free flat view as (1, n), block along
    # the lane axis and let Pallas mask the partial final block.  No jnp.pad and
    # no output slice -> no extra HBM round trips.
    chunk = sub * _LANE
    tile = max(chunk,
               min(target_block_bytes // itemsize, 128 * 1024) // chunk * chunk)
    if n > chunk:
        cap = max(chunk, pl.cdiv(pl.cdiv(n, _MIN_STEPS), chunk) * chunk)
        tile = min(tile, cap)
    grid = (pl.cdiv(n, tile),)
    return (1, n), (1, tile), lambda i: (0, i), grid, tile * itemsize


def _pallas_elementwise(kernel, arrays, out_dtype):
    """Apply an elementwise kernel over same-shaped arrays via a lane-dense view."""
    x0 = arrays[0]
    orig_shape = x0.shape
    n = x0.size
    view_shape, block_shape, index_map, grid, block_bytes = _plan_layout(n, out_dtype)

    _, vmem_budget = _gen_params()
    num_arrays = len(arrays) + 1                  # inputs + output

    # Deeper input buffering only if supported, the grid is long enough to
    # benefit, and the 3-buffer working set still fits this generation's budget.
    need3 = 3 * num_arrays * block_bytes + _VMEM_MARGIN
    use_deep = _buffered_supported() and grid[0] >= 6 and need3 <= vmem_budget
    num_bufs = 3 if use_deep else 2
    need = num_bufs * num_arrays * block_bytes + _VMEM_MARGIN
    vmem_limit = int(min(vmem_budget, max(need, 8 << 20)))

    in_kwargs = {"pipeline_mode": pl.Buffered(3)} if use_deep else {}
    in_spec = pl.BlockSpec(block_shape, index_map, **in_kwargs)
    out_spec = pl.BlockSpec(block_shape, index_map)

    out2d = pl.pallas_call(
        kernel,
        out_shape=jax.ShapeDtypeStruct(view_shape, out_dtype),
        grid_spec=pltpu.PrefetchScalarGridSpec(
            num_scalar_prefetch=0,
            grid=grid,
            in_specs=[in_spec] * len(arrays),
            out_specs=out_spec,
        ),
        compiler_params=pltpu.CompilerParams(
            dimension_semantics=("parallel",),
            vmem_limit_bytes=vmem_limit,
        ),
    )(*(a.reshape(view_shape) for a in arrays))

    return out2d.reshape(orig_shape)


# --------------------------------- public op ---------------------------------


def _use_fast_path(x):
    return x.size * jnp.dtype(x.dtype).itemsize < _FAST_PATH_BYTES


def _exp_forward(x):
    if _use_fast_path(x):
        return jnp.exp(x)                         # tiny: one fused XLA pass is optimal
    return _pallas_elementwise(_exp_kernel, [x], x.dtype)


def _bwd_from_y(y, g, clip):
    c = min(float(clip), 700.0)                   # avoid Python math.exp overflow
    lo, hi = math.exp(-c), math.exp(c)
    if _use_fast_path(y):
        return g * jnp.clip(y, lo, hi)
    # TODO(synk): if `clip` must vary per call without retracing, pass exp(+/-clip)
    # through SMEM instead of baking them in as compile-time constants.
    kern = functools.partial(_bwd_kernel, lo=lo, hi=hi)
    return _pallas_elementwise(kern, [y, g], y.dtype)


@functools.partial(jax.custom_vjp, nondiff_argnums=(1,))
def _trunc_exp_core(x, clip):
    return _exp_forward(x)


def _trunc_exp_fwd(x, clip):
    y = _exp_forward(x)
    return y, y                                   # residual = y -> transcendental-free bwd


def _trunc_exp_bwd(clip, y, g):
    return (_bwd_from_y(y, g, clip),)


_trunc_exp_core.defvjp(_trunc_exp_fwd, _trunc_exp_bwd)


def trunc_exp(x, clip=15.0):
    """TruncExp: forward = exp(x); backward = g * exp(clamp(x, -clip, clip))."""
    return _trunc_exp_core(x, float(clip))


class TruncExp:
    """Drop-in analogue of the PyTorch nn.Module."""

    def __init__(self, clip=15.0):
        self.clip = float(clip)

    def __call__(self, x):
        return trunc_exp(x, self.clip)


# ------------------------------------ test -----------------------------------

if __name__ == "__main__":
    key = jax.random.PRNGKey(0)
    k1, k2, k3 = jax.random.split(key, 3)
    clip = 2.0

    # Small NCHW tensor matching the module spec ("any tensor") -> fast path.
    x_small = jax.random.normal(k1, (2, 4, 16, 16), dtype=jnp.float32)
    y_small = jax.block_until_ready(trunc_exp(x_small, clip=15.0))
    assert y_small.shape == x_small.shape and y_small.dtype == x_small.dtype
    assert jnp.allclose(y_small, jnp.exp(x_small), rtol=1e-5, atol=1e-6)

    # Lane-aligned tensor -> 2D lane-dense Pallas forward + backward kernels.
    x_big = jax.random.normal(k2, (2, 4, 64, 128), dtype=jnp.float32)
    y_big = jax.block_until_ready(trunc_exp(x_big, clip=15.0))
    assert y_big.shape == x_big.shape and y_big.dtype == x_big.dtype
    assert jnp.allclose(y_big, jnp.exp(x_big), rtol=1e-5, atol=1e-6)

    g_big = jax.block_until_ready(jax.grad(lambda v: jnp.sum(trunc_exp(v, clip)))(x_big))
    g_big_ref = jnp.exp(jnp.clip(x_big, -clip, clip))
    assert jnp.allclose(g_big, g_big_ref, rtol=1e-5, atol=1e-6)

    # Ragged size (size % 128 != 0) -> masked (1, n) Pallas path, no pad/slice copies.
    x_rag = jax.random.normal(k3, (257, 129), dtype=jnp.float32)
    y_rag = jax.block_until_ready(trunc_exp(x_rag, clip=15.0))
    assert y_rag.shape == x_rag.shape and y_rag.dtype == x_rag.dtype
    assert jnp.allclose(y_rag, jnp.exp(x_rag), rtol=1e-5, atol=1e-6)

    g_rag = jax.block_until_ready(jax.grad(lambda v: jnp.sum(trunc_exp(v, clip)))(x_rag))
    g_rag_ref = jnp.exp(jnp.clip(x_rag, -clip, clip))
    assert jnp.allclose(g_rag, g_rag_ref, rtol=1e-5, atol=1e-6)

    print("KERNEL_OK")
</pallas_src>

<mosaic_0001>
module attributes {stable_mosaic.version = 11 : i64} {
  func.func @_exp_kernel(%arg0: i32, %arg1: memref<8x8192xf32, #tpu.memory_space<vmem>>, %arg2: memref<8x8192xf32, #tpu.memory_space<vmem>>) attributes {dimension_semantics = [#tpu.dimension_semantics<parallel>], iteration_bounds = array<i64: 1>, scalar_prefetch = 0 : i64, scratch_operands = 0 : i64, tpu.core_type = #tpu.core_type<tc>, window_params = [{transform_indices = @transform_0, window_bounds = array<i64: 8, 8192>}, {transform_indices = @transform_1, window_bounds = array<i64: 8, 8192>}]} {
    %c0 = arith.constant 0 : index
    %c0_0 = arith.constant 0 : index
    %0 = vector.load %arg1[%c0, %c0_0] : memref<8x8192xf32, #tpu.memory_space<vmem>>, vector<8x8192xf32>
    %1 = math.exp %0 : vector<8x8192xf32>
    %c0_1 = arith.constant 0 : index
    %c0_2 = arith.constant 0 : index
    %2 = vector.load %arg2[%c0_1, %c0_2] : memref<8x8192xf32, #tpu.memory_space<vmem>>, vector<8x8192xf32>
    tpu.vector_store %arg2[%c0_1, %c0_2], %1 {strides = array<i32>} : memref<8x8192xf32, #tpu.memory_space<vmem>>, vector<8x8192xf32>,
    return
  }
  func.func @transform_0(%arg0: i32) -> (i32, i32) {
    %c0_i32 = arith.constant 0 : i32
    %c0_i32_0 = arith.constant 0 : i32
    return %arg0, %c0_i32 : i32, i32
  }
  func.func @transform_1(%arg0: i32) -> (i32, i32) {
    %c0_i32 = arith.constant 0 : i32
    %c0_i32_0 = arith.constant 0 : i32
    return %arg0, %c0_i32 : i32, i32
  }
}

</mosaic_0001>

<bundles_post_ra>
// kernel: tpu_custom_call.1
= control target key start
LH: loop header
LB: loop body
LE: loop exit
PB: predicated region body
PF: predicated region fallthrough
CT: control target
= control target key end

     0   :  { %6 = vsyncpa [#allocation3], 0  ;;  %s484_s0 = inlined_call_operand.hbm [shape: f32[8,8192], index: 0, kind: input, shape index: {}]   ;;  %s485_s1 = inlined_call_operand.hbm [shape: f32[8,8192], index: 1, kind: output, shape index: {}]  }
   0x1   :  { %7 = vsyncpa [#allocation4], 0  ;;  %s466_s6 = smov [#allocation2]  }
   0x2   :  { %s14_s7 = sshll.u32 %s466_s6, 4  ;;  %s15_s7 = int_to_ptr.vmem [resolvable:$true] %s14_s7 }
   0x3   :  { %s430_s8 = scalar_lea.vmem %s15_s7, 8192  ;;  %p435_p1 = scmp.lt.s32.totalorder %s15_s7, %s15_s7 }
   0x4   :  { %p431_p0 = scmp.ne.s32.totalorder %s15_s7, %s430_s8  ;;  %p436_p2 = scmp.lt.s32.totalorder %s430_s8, %s430_s8 }
   0x6   :  { %p437_p3 = por %p436_p2, %p435_p1 }
   0x8   :  { %p438_p4 = pnand %p437_p3, %p431_p0 }
   0xa   :  { %441 = shalt.err (!%p438_p4)
}
   0xb   :  { %17 = dma.hbm_to_vmem [thread:$0]  %s484_s0, 8192, %s15_s7, [#allocation3]  }
   0xc   :  { %462 = dma.done.wait [#allocation3], 8192  }
   0xd   :  { %463 = vsyncadd [#allocation3], 4294959104  ;;  %v21_v0 = vld [vmem:[#allocation2] sm:$0xff]  ;;  %v22_v1 = vld [vmem:[#allocation2 + $0x8] sm:$0xff]  ;;  %s467_s0 = smov [#allocation5]  }
   0xe   :  { %v23_v2 = vld [vmem:[#allocation2 + $0x10] sm:$0xff]  ;;  %v85_v3 = vmul.f32 1.442695, %v21_v0  ;;  %v87_v4 = vmul.f32 1.442695, %v22_v1  ;;  %v24_v6 = vld [vmem:[#allocation2 + $0x18] sm:$0xff] }
   0xf   :  { %v89_v5 = vmul.f32 1.442695, %v23_v2  ;;  %v25_v7 = vld [vmem:[#allocation2 + $0x20] sm:$0xff]  ;;  %v26_v8 = vld [vmem:[#allocation2 + $0x28] sm:$0xff]  ;;  %v91_v9 = vmul.f32 1.442695, %v24_v6 }
  0x10   :  { %294 = vpow2.f32 %v85_v3  ;;  %v93_v10 = vmul.f32 1.442695, %v25_v7  ;;  %v95_v11 = vmul.f32 1.442695, %v26_v8  ;;  %v27_v12 = vld [vmem:[#allocation2 + $0x30] sm:$0xff]  ;;  %v28_v13 = vld [vmem:[#allocation2 + $0x38] sm:$0xff] }
  0x11   :  { %296 = vpow2.f32 %v87_v4  ;;  %v29_v14 = vld [vmem:[#allocation2 + $0x40] sm:$0xff]  ;;  %v97_v15 = vmul.f32 1.442695, %v27_v12  ;;  %v99_v16 = vmul.f32 1.442695, %v28_v13  ;;  %v30_v17 = vld [vmem:[#allocation2 + $0x48] sm:$0xff] }
  0x12   :  { %298 = vpow2.f32 %v89_v5  ;;  %v31_v18 = vld [vmem:[#allocation2 + $0x50] sm:$0xff]  ;;  %v101_v19 = vmul.f32 1.442695, %v29_v14  ;;  %v32_v20 = vld [vmem:[#allocation2 + $0x58] sm:$0xff]  ;;  %v103_v21 = vmul.f32 1.442695, %v30_v17 }
  0x13   :  { %300 = vpow2.f32 %v91_v9  ;;  %v33_v22 = vld [vmem:[#allocation2 + $0x60] sm:$0xff]  ;;  %v105_v23 = vmul.f32 1.442695, %v31_v18  ;;  %v34_v24 = vld [vmem:[#allocation2 + $0x68] sm:$0xff]  ;;  %v107_v25 = vmul.f32 1.442695, %v32_v20 }
  0x14   :  { %302 = vpow2.f32 %v93_v10  ;;  %v35_v26 = vld [vmem:[#allocation2 + $0x70] sm:$0xff]  ;;  %v109_v27 = vmul.f32 1.442695, %v33_v22  ;;  %v36_v28 = vld [vmem:[#allocation2 + $0x78] sm:$0xff]  ;;  %v111_v29 = vmul.f32 1.442695, %v34_v24 }
  0x15   :  { %304 = vpow2.f32 %v95_v11  ;;  %v37_v30 = vld [vmem:[#allocation2 + $0x80] sm:$0xff]  ;;  %v113_v31 = vmul.f32 1.442695, %v35_v26  ;;  %v38_v32 = vld [vmem:[#allocation2 + $0x88] sm:$0xff]  ;;  %v115_v33 = vmul.f32 1.442695, %v36_v28 }
  0x16   :  { %306 = vpow2.f32 %v97_v15  ;;  %v39_v34 = vld [vmem:[#allocation2 + $0x90] sm:$0xff]  ;;  %v117_v35 = vmul.f32 1.442695, %v37_v30  ;;  %v40_v36 = vld [vmem:[#allocation2 + $0x98] sm:$0xff]  ;;  %v119_v38 = vmul.f32 1.442695, %v38_v32 }
  0x17   :  { %308 = vpow2.f32 %v99_v16  ;;  %v41_v39 = vld [vmem:[#allocation2 + $0xa0] sm:$0xff]  ;;  %v121_v41 = vmul.f32 1.442695, %v39_v34  ;;  %v42_v42 = vld [vmem:[#allocation2 + $0xa8] sm:$0xff]  ;;  %v123_v44 = vmul.f32 1.442695, %v40_v36 }
  0x18   :  { %310 = vpow2.f32 %v101_v19  ;;  %v43_v45 = vld [vmem:[#allocation2 + $0xb0] sm:$0xff]  ;;  %v125_v47 = vmul.f32 1.442695, %v41_v39  ;;  %v44_v48 = vld [vmem:[#allocation2 + $0xb8] sm:$0xff]  ;;  %v127_v50 = vmul.f32 1.442695, %v42_v42 }
  0x19   :  { %312 = vpow2.f32 %v103_v21  ;;  %v45_v51 = vld [vmem:[#allocation2 + $0xc0] sm:$0xff]  ;;  %v129_v53 = vmul.f32 1.442695, %v43_v45  ;;  %v46_v54 = vld [vmem:[#allocation2 + $0xc8] sm:$0xff]  ;;  %v131_v56 = vmul.f32 1.442695, %v44_v48 }
  0x1a   :  { %314 = vpow2.f32 %v105_v23  ;;  %v47_v57 = vld [vmem:[#allocation2 + $0xd0] sm:$0xff]  ;;  %v133_v59 = vmul.f32 1.442695, %v45_v51  ;;  %v48_v60 = vld [vmem:[#allocation2 + $0xd8] sm:$0xff]  ;;  %v135_v62 = vmul.f32 1.442695, %v46_v54 }
  0x1b   :  { %316 = vpow2.f32 %v107_v25  ;;  %v49_v63 = vld [vmem:[#allocation2 + $0xe0] sm:$0xff]  ;;  %v137_v1 = vmul.f32 1.442695, %v47_v57  ;;  %v50_v2 = vld [vmem:[#allocation2 + $0xe8] sm:$0xff]  ;;  %v139_v4 = vmul.f32 1.442695, %v48_v60 }
  0x1c   :  { %318 = vpow2.f32 %v109_v27  ;;  %v51_v5 = vld [vmem:[#allocation2 + $0xf0] sm:$0xff]  ;;  %v141_v7 = vmul.f32 1.442695, %v49_v63  ;;  %v52_v8 = vld [vmem:[#allocation2 + $0xf8] sm:$0xff]  ;;  %v143_v10 = vmul.f32 1.442695, %v50_v2 }
  0x1d   :  { %v295_v37 = vpop.eup %294  ;;  %320 = vpow2.f32 %v111_v29  ;;  %v53_v11 = vld [vmem:[#allocation2 + $0x100] sm:$0xff]  ;;  %v145_v13 = vmul.f32 1.442695, %v51_v5  ;;  %v54_v14 = vld [vmem:[#allocation2 + $0x108] sm:$0xff]  ;;  %v147_v16 = vmul.f32 1.442695, %v52_v8 }
  0x1e   :  { %v297_v40 = vpop.eup %296  ;;  %213 = vst [vmem:[#allocation5] sm:$0xff] %v295_v37  ;;  %322 = vpow2.f32 %v113_v31  ;;  %v55_v17 = vld [vmem:[#allocation2 + $0x110] sm:$0xff]  ;;  %v149_v19 = vmul.f32 1.442695, %v53_v11  ;;  %v56_v20 = vld [vmem:[#allocation2 + $0x118] sm:$0xff]  ;;  %v57_v23 = vld [vmem:[#allocation2 + $0x120] sm:$0xff] }
  0x1f   :  { %v299_v43 = vpop.eup %298  ;;  %214 = vst [vmem:[#allocation5 + $0x8] sm:$0xff] %v297_v40  ;;  %324 = vpow2.f32 %v115_v33  ;;  %v151_v22 = vmul.f32 1.442695, %v54_v14  ;;  %v153_v25 = vmul.f32 1.442695, %v55_v17  ;;  %v58_v26 = vld [vmem:[#allocation2 + $0x128] sm:$0xff] }
  0x20   :  { %v301_v46 = vpop.eup %300  ;;  %215 = vst [vmem:[#allocation5 + $0x10] sm:$0xff] %v299_v43  ;;  %326 = vpow2.f32 %v117_v35  ;;  %v155_v28 = vmul.f32 1.442695, %v56_v20  ;;  %v59_v29 = vld [vmem:[#allocation2 + $0x130] sm:$0xff]  ;;  %v157_v31 = vmul.f32 1.442695, %v57_v23 }
  0x21   :  { %v303_v49 = vpop.eup %302  ;;  %216 = vst [vmem:[#allocation5 + $0x18] sm:$0xff] %v301_v46  ;;  %328 = vpow2.f32 %v119_v38  ;;  %v60_v32 = vld [vmem:[#allocation2 + $0x138] sm:$0xff]  ;;  %v159_v34 = vmul.f32 1.442695, %v58_v26  ;;  %v61_v35 = vld [vmem:[#allocation2 + $0x140] sm:$0xff]  ;;  %v62_v38 = vld [vmem:[#allocation2 + $0x148] sm:$0xff] }
  0x22   :  { %v305_v52 = vpop.eup %304  ;;  %217 = vst [vmem:[#allocation5 + $0x20] sm:$0xff] %v303_v49  ;;  %330 = vpow2.f32 %v121_v41  ;;  %v161_v37 = vmul.f32 1.442695, %v59_v29  ;;  %v163_v40 = vmul.f32 1.442695, %v60_v32  ;;  %v63_v41 = vld [vmem:[#allocation2 + $0x150] sm:$0xff] }
  0x23   :  { %v307_v55 = vpop.eup %306  ;;  %218 = vst [vmem:[#allocation5 + $0x28] sm:$0xff] %v305_v52  ;;  %332 = vpow2.f32 %v123_v44  ;;  %v165_v43 = vmul.f32 1.442695, %v61_v35  ;;  %v64_v44 = vld [vmem:[#allocation2 + $0x158] sm:$0xff]  ;;  %v167_v46 = vmul.f32 1.442695, %v62_v38 }
  0x24   :  { %v309_v58 = vpop.eup %308  ;;  %219 = vst [vmem:[#allocation5 + $0x30] sm:$0xff] %v307_v55  ;;  %334 = vpow2.f32 %v125_v47  ;;  %v65_v47 = vld [vmem:[#allocation2 + $0x160] sm:$0xff]  ;;  %v169_v49 = vmul.f32 1.442695, %v63_v41  ;;  %v171_v52 = vmul.f32 1.442695, %v64_v44 }
  0x25   :  { %v311_v61 = vpop.eup %310  ;;  %220 = vst [vmem:[#allocation5 + $0x38] sm:$0xff] %v309_v58  ;;  %336 = vpow2.f32 %v127_v50  ;;  %v66_v50 = vld [vmem:[#allocation2 + $0x168] sm:$0xff]  ;;  %v173_v55 = vmul.f32 1.442695, %v65_v47  ;;  %s283_s11 = sshll.u32 %s467_s0, 4  ;;  %s284_s11 = int_to_ptr.vmem [resolvable:$true] %s283_s11 }
  0x26   :  { %v313_v0 = vpop.eup %312  ;;  %221 = vst [vmem:[#allocation5 + $0x40] sm:$0xff] %v311_v61  ;;  %338 = vpow2.f32 %v129_v53  ;;  %v67_v53 = vld [vmem:[#allocation2 + $0x170] sm:$0xff]  ;;  %v175_v58 = vmul.f32 1.442695, %v66_v50  ;;  %s442_s12 = scalar_lea.vmem %s284_s11, 8192  ;;  %p447_p6 = scmp.lt.s32.totalorder %s284_s11, %s284_s11 }
  0x27   :  { %v315_v3 = vpop.eup %314  ;;  %222 = vst [vmem:[#allocation5 + $0x48] sm:$0xff] %v313_v0  ;;  %340 = vpow2.f32 %v131_v56  ;;  %v68_v56 = vld [vmem:[#allocation2 + $0x178] sm:$0xff]  ;;  %v177_v61 = vmul.f32 1.442695, %v67_v53  ;;  %p443_p5 = scmp.ne.s32.totalorder %s284_s11, %s442_s12  ;;  %p448_p7 = scmp.lt.s32.totalorder %s442_s12, %s442_s12 }
  0x28   :  { %v317_v6 = vpop.eup %316  ;;  %223 = vst [vmem:[#allocation5 + $0x50] sm:$0xff] %v315_v3  ;;  %342 = vpow2.f32 %v133_v59  ;;  %v69_v59 = vld [vmem:[#allocation2 + $0x180] sm:$0xff]  ;;  %v179_v0 = vmul.f32 1.442695, %v68_v56 }
  0x29   :  { %v319_v9 = vpop.eup %318  ;;  %224 = vst [vmem:[#allocation5 + $0x58] sm:$0xff] %v317_v6  ;;  %344 = vpow2.f32 %v135_v62  ;;  %v70_v62 = vld [vmem:[#allocation2 + $0x188] sm:$0xff]  ;;  %v181_v3 = vmul.f32 1.442695, %v69_v59  ;;  %p449_p8 = por %p448_p7, %p447_p6 }
  0x2a   :  { %v321_v12 = vpop.eup %320  ;;  %225 = vst [vmem:[#allocation5 + $0x60] sm:$0xff] %v319_v9  ;;  %346 = vpow2.f32 %v137_v1  ;;  %v71_v1 = vld [vmem:[#allocation2 + $0x190] sm:$0xff]  ;;  %v183_v6 = vmul.f32 1.442695, %v70_v62 }
  0x2b   :  { %v323_v15 = vpop.eup %322  ;;  %226 = vst [vmem:[#allocation5 + $0x68] sm:$0xff] %v321_v12  ;;  %348 = vpow2.f32 %v139_v4  ;;  %v72_v4 = vld [vmem:[#allocation2 + $0x198] sm:$0xff]  ;;  %v185_v9 = vmul.f32 1.442695, %v71_v1  ;;  %p450_p9 = pnand %p449_p8, %p443_p5 }
  0x2c   :  { %v325_v18 = vpop.eup %324  ;;  %227 = vst [vmem:[#allocation5 + $0x70] sm:$0xff] %v323_v15  ;;  %350 = vpow2.f32 %v141_v7  ;;  %v73_v7 = vld [vmem:[#allocation2 + $0x1a0] sm:$0xff]  ;;  %v187_v12 = vmul.f32 1.442695, %v72_v4 }
  0x2d   :  { %v327_v21 = vpop.eup %326  ;;  %228 = vst [vmem:[#allocation5 + $0x78] sm:$0xff] %v325_v18  ;;  %352 = vpow2.f32 %v143_v10  ;;  %v74_v10 = vld [vmem:[#allocation2 + $0x1a8] sm:$0xff]  ;;  %v189_v15 = vmul.f32 1.442695, %v73_v7 }
  0x2e   :  { %v329_v24 = vpop.eup %328  ;;  %229 = vst [vmem:[#allocation5 + $0x80] sm:$0xff] %v327_v21  ;;  %354 = vpow2.f32 %v145_v13  ;;  %v75_v13 = vld [vmem:[#allocation2 + $0x1b0] sm:$0xff]  ;;  %v191_v18 = vmul.f32 1.442695, %v74_v10 }
  0x2f   :  { %v331_v27 = vpop.eup %330  ;;  %230 = vst [vmem:[#allocation5 + $0x88] sm:$0xff] %v329_v24  ;;  %356 = vpow2.f32 %v147_v16  ;;  %v76_v16 = vld [vmem:[#allocation2 + $0x1b8] sm:$0xff]  ;;  %v193_v21 = vmul.f32 1.442695, %v75_v13 }
  0x30   :  { %v333_v30 = vpop.eup %332  ;;  %231 = vst [vmem:[#allocation5 + $0x90] sm:$0xff] %v331_v27  ;;  %358 = vpow2.f32 %v149_v19  ;;  %v77_v19 = vld [vmem:[#allocation2 + $0x1c0] sm:$0xff]  ;;  %v195_v24 = vmul.f32 1.442695, %v76_v16 }
  0x31   :  { %v335_v33 = vpop.eup %334  ;;  %232 = vst [vmem:[#allocation5 + $0x98] sm:$0xff] %v333_v30  ;;  %360 = vpow2.f32 %v151_v22  ;;  %v78_v22 = vld [vmem:[#allocation2 + $0x1c8] sm:$0xff]  ;;  %v197_v27 = vmul.f32 1.442695, %v77_v19 }
  0x32   :  { %v337_v36 = vpop.eup %336  ;;  %233 = vst [vmem:[#allocation5 + $0xa0] sm:$0xff] %v335_v33  ;;  %362 = vpow2.f32 %v153_v25  ;;  %v79_v25 = vld [vmem:[#allocation2 + $0x1d0] sm:$0xff]  ;;  %v199_v30 = vmul.f32 1.442695, %v78_v22 }
  0x33   :  { %v339_v39 = vpop.eup %338  ;;  %234 = vst [vmem:[#allocation5 + $0xa8] sm:$0xff] %v337_v36  ;;  %364 = vpow2.f32 %v155_v28  ;;  %v80_v28 = vld [vmem:[#allocation2 + $0x1d8] sm:$0xff]  ;;  %v201_v33 = vmul.f32 1.442695, %v79_v25 }
  0x34   :  { %v341_v42 = vpop.eup %340  ;;  %235 = vst [vmem:[#allocation5 + $0xb0] sm:$0xff] %v339_v39  ;;  %366 = vpow2.f32 %v157_v31  ;;  %v81_v31 = vld [vmem:[#allocation2 + $0x1e0] sm:$0xff]  ;;  %v203_v36 = vmul.f32 1.442695, %v80_v28 }
  0x35   :  { %v343_v45 = vpop.eup %342  ;;  %236 = vst [vmem:[#allocation5 + $0xb8] sm:$0xff] %v341_v42  ;;  %368 = vpow2.f32 %v159_v34  ;;  %v82_v34 = vld [vmem:[#allocation2 + $0x1e8] sm:$0xff]  ;;  %v205_v39 = vmul.f32 1.442695, %v81_v31 }
  0x36   :  { %v345_v48 = vpop.eup %344  ;;  %237 = vst [vmem:[#allocation5 + $0xc0] sm:$0xff] %v343_v45  ;;  %370 = vpow2.f32 %v161_v37  ;;  %v83_v37 = vld [vmem:[#allocation2 + $0x1f0] sm:$0xff]  ;;  %v207_v42 = vmul.f32 1.442695, %v82_v34 }
  0x37   :  { %v347_v51 = vpop.eup %346  ;;  %238 = vst [vmem:[#allocation5 + $0xc8] sm:$0xff] %v345_v48  ;;  %372 = vpow2.f32 %v163_v40  ;;  %v84_v40 = vld [vmem:[#allocation2 + $0x1f8] sm:$0xff]  ;;  %v209_v44 = vmul.f32 1.442695, %v83_v37 }
  0x38   :  { %v349_v54 = vpop.eup %348  ;;  %239 = vst [vmem:[#allocation5 + $0xd0] sm:$0xff] %v347_v51  ;;  %374 = vpow2.f32 %v165_v43 }
  0x39   :  { %v351_v57 = vpop.eup %350  ;;  %240 = vst [vmem:[#allocation5 + $0xd8] sm:$0xff] %v349_v54  ;;  %376 = vpow2.f32 %v167_v46  ;;  %v211_v46 = vmul.f32 1.442695, %v84_v40 }
  0x3a   :  { %v353_v60 = vpop.eup %352  ;;  %241 = vst [vmem:[#allocation5 + $0xe0] sm:$0xff] %v351_v57  ;;  %378 = vpow2.f32 %v169_v49 }
  0x3b   :  { %v355_v63 = vpop.eup %354  ;;  %242 = vst [vmem:[#allocation5 + $0xe8] sm:$0xff] %v353_v60  ;;  %380 = vpow2.f32 %v171_v52 }
  0x3c   :  { %v357_v2 = vpop.eup %356  ;;  %243 = vst [vmem:[#allocation5 + $0xf0] sm:$0xff] %v355_v63  ;;  %382 = vpow2.f32 %v173_v55 }
  0x3d   :  { %v359_v5 = vpop.eup %358  ;;  %244 = vst [vmem:[#allocation5 + $0xf8] sm:$0xff] %v357_v2  ;;  %384 = vpow2.f32 %v175_v58 }
  0x3e   :  { %v361_v8 = vpop.eup %360  ;;  %245 = vst [vmem:[#allocation5 + $0x100] sm:$0xff] %v359_v5  ;;  %386 = vpow2.f32 %v177_v61 }
  0x3f   :  { %v363_v11 = vpop.eup %362  ;;  %246 = vst [vmem:[#allocation5 + $0x108] sm:$0xff] %v361_v8  ;;  %388 = vpow2.f32 %v179_v0 }
  0x40   :  { %v365_v14 = vpop.eup %364  ;;  %247 = vst [vmem:[#allocation5 + $0x110] sm:$0xff] %v363_v11  ;;  %390 = vpow2.f32 %v181_v3 }
  0x41   :  { %v367_v17 = vpop.eup %366  ;;  %248 = vst [vmem:[#allocation5 + $0x118] sm:$0xff] %v365_v14  ;;  %392 = vpow2.f32 %v183_v6 }
  0x42   :  { %v369_v20 = vpop.eup %368  ;;  %249 = vst [vmem:[#allocation5 + $0x120] sm:$0xff] %v367_v17  ;;  %394 = vpow2.f32 %v185_v9 }
  0x43   :  { %v371_v23 = vpop.eup %370  ;;  %250 = vst [vmem:[#allocation5 + $0x128] sm:$0xff] %v369_v20  ;;  %396 = vpow2.f32 %v187_v12 }
  0x44   :  { %v373_v26 = vpop.eup %372  ;;  %251 = vst [vmem:[#allocation5 + $0x130] sm:$0xff] %v371_v23  ;;  %398 = vpow2.f32 %v189_v15 }
  0x45   :  { %v375_v29 = vpop.eup %374  ;;  %252 = vst [vmem:[#allocation5 + $0x138] sm:$0xff] %v373_v26  ;;  %400 = vpow2.f32 %v191_v18 }
  0x46   :  { %v377_v32 = vpop.eup %376  ;;  %253 = vst [vmem:[#allocation5 + $0x140] sm:$0xff] %v375_v29  ;;  %402 = vpow2.f32 %v193_v21 }
  0x47   :  { %v379_v35 = vpop.eup %378  ;;  %254 = vst [vmem:[#allocation5 + $0x148] sm:$0xff] %v377_v32  ;;  %404 = vpow2.f32 %v195_v24 }
  0x48   :  { %v381_v38 = vpop.eup %380  ;;  %255 = vst [vmem:[#allocation5 + $0x150] sm:$0xff] %v379_v35  ;;  %406 = vpow2.f32 %v197_v27 }
  0x49   :  { %v383_v41 = vpop.eup %382  ;;  %256 = vst [vmem:[#allocation5 + $0x158] sm:$0xff] %v381_v38  ;;  %408 = vpow2.f32 %v199_v30 }
  0x4a   :  { %v385_v43 = vpop.eup %384  ;;  %257 = vst [vmem:[#allocation5 + $0x160] sm:$0xff] %v383_v41  ;;  %410 = vpow2.f32 %v201_v33 }
  0x4b   :  { %v387_v45 = vpop.eup %386  ;;  %258 = vst [vmem:[#allocation5 + $0x168] sm:$0xff] %v385_v43  ;;  %412 = vpow2.f32 %v203_v36 }
  0x4c   :  { %v389_v47 = vpop.eup %388  ;;  %259 = vst [vmem:[#allocation5 + $0x170] sm:$0xff] %v387_v45  ;;  %414 = vpow2.f32 %v205_v39 }
  0x4d   :  { %v391_v48 = vpop.eup %390  ;;  %260 = vst [vmem:[#allocation5 + $0x178] sm:$0xff] %v389_v47  ;;  %416 = vpow2.f32 %v207_v42 }
  0x4e   :  { %v393_v49 = vpop.eup %392  ;;  %261 = vst [vmem:[#allocation5 + $0x180] sm:$0xff] %v391_v48  ;;  %418 = vpow2.f32 %v209_v44 }
  0x4f   :  { %v395_v50 = vpop.eup %394  ;;  %262 = vst [vmem:[#allocation5 + $0x188] sm:$0xff] %v393_v49  ;;  %420 = vpow2.f32 %v211_v46 }
  0x50   :  { %v397_v51 = vpop.eup %396  ;;  %263 = vst [vmem:[#allocation5 + $0x190] sm:$0xff] %v395_v50 }
  0x51   :  { %v399_v52 = vpop.eup %398  ;;  %264 = vst [vmem:[#allocation5 + $0x198] sm:$0xff] %v397_v51 }
  0x52   :  { %v401_v53 = vpop.eup %400  ;;  %265 = vst [vmem:[#allocation5 + $0x1a0] sm:$0xff] %v399_v52 }
  0x53   :  { %v403_v54 = vpop.eup %402  ;;  %266 = vst [vmem:[#allocation5 + $0x1a8] sm:$0xff] %v401_v53 }
  0x54   :  { %v405_v55 = vpop.eup %404  ;;  %267 = vst [vmem:[#allocation5 + $0x1b0] sm:$0xff] %v403_v54 }
  0x55   :  { %v407_v56 = vpop.eup %406  ;;  %268 = vst [vmem:[#allocation5 + $0x1b8] sm:$0xff] %v405_v55 }
  0x56   :  { %v409_v57 = vpop.eup %408  ;;  %269 = vst [vmem:[#allocation5 + $0x1c0] sm:$0xff] %v407_v56 }
  0x57   :  { %v411_v58 = vpop.eup %410  ;;  %270 = vst [vmem:[#allocation5 + $0x1c8] sm:$0xff] %v409_v57 }
  0x58   :  { %v413_v59 = vpop.eup %412  ;;  %271 = vst [vmem:[#allocation5 + $0x1d0] sm:$0xff] %v411_v58 }
  0x59   :  { %v415_v60 = vpop.eup %414  ;;  %272 = vst [vmem:[#allocation5 + $0x1d8] sm:$0xff] %v413_v59 }
  0x5a   :  { %v417_v61 = vpop.eup %416  ;;  %273 = vst [vmem:[#allocation5 + $0x1e0] sm:$0xff] %v415_v60 }
  0x5b   :  { %v419_v62 = vpop.eup %418  ;;  %274 = vst [vmem:[#allocation5 + $0x1e8] sm:$0xff] %v417_v61 }
  0x5c   :  { %v421_v63 = vpop.eup %420  ;;  %275 = vst [vmem:[#allocation5 + $0x1f0] sm:$0xff] %v419_v62 }
  0x5d   :  { %276 = vst [vmem:[#allocation5 + $0x1f8] sm:$0xff] %v421_v63 }
  0x5e   :  { %453 = shalt.err (!%p450_p9)
}
  0x5f   :  { %286 = dma.vmem_to_hbm [thread:$0]  %s284_s11, 8192, %s485_s1, [#allocation4]  }
  0x60   :  { %464 = dma.done.wait [#allocation4], 8192  }
  0x61   :  { %465 = vsyncadd [#allocation4], 4294959104 }
  0x62   :  { %290 = vsyncpa [#allocation3], 1 }
  0x63   :  { %291 = vsyncpa [#allocation4], 1 }

</bundles_post_ra>
